<compile_context>
chip_gen: v6e
topology: v6e:2x2x1
jax: 0.10.0
libtpu: 0.0.40
codegen_flags: <defaults>
</compile_context>

<pallas_src>
import functools

import jax
import jax.numpy as jnp
from jax.experimental import pallas as pl
from jax.experimental.pallas import tpu as pltpu

LANE = 128
MAX_BLOCK_ROWS = 1024      # (1024, 128) f32 tile = 512 KiB per input per step
NUM_CORE_SPLITS = 2        # leading "parallel" grid axis (2 TCs on v7x)
OUT_ROWS = 8               # output slab rows (keeps (8, 128) tiling exactly)


def _round_up(x: int, m: int) -> int:
    return ((x + m - 1) // m) * m


def _iou_partial_kernel(p_ref, t_ref, o_ref, acc_pt, acc_p, acc_t, *,
                        total_rows: int, block_rows: int, mask_from_block):
    """Accumulate sum(p*t), sum(p), sum(t) for this core's slice of rows."""
    j = pl.program_id(1)

    @pl.when(j == 0)
    def _init():
        acc_pt[...] = jnp.zeros_like(acc_pt)
        acc_p[...] = jnp.zeros_like(acc_p)
        acc_t[...] = jnp.zeros_like(acc_t)

    # Upcast on the VMEM tile (inputs stay in native dtype in HBM).
    p = p_ref[...].astype(jnp.float32)
    t = t_ref[...].astype(jnp.float32)

    def accumulate(pv, tv):
        acc_pt[...] += pv * tv
        acc_p[...] += pv
        acc_t[...] += tv

    if mask_from_block is None:
        # Rows divide evenly across blocks and cores: no masking needed at all.
        accumulate(p, t)
    else:
        # Nominal (unclamped) block index for this step; blocks at or past
        # `mask_from_block` are either ragged or clamped duplicates and get a
        # row-validity mask. Everything before stays on the fast unmasked path.
        nominal = pl.program_id(0) * pl.num_programs(1) + j

        @pl.when(nominal < mask_from_block)
        def _full_block():
            accumulate(p, t)

        @pl.when(nominal >= mask_from_block)
        def _edge_block():
            row_iota = jax.lax.broadcasted_iota(
                jnp.int32, (block_rows, LANE), 0)
            valid = (nominal * block_rows + row_iota) < total_rows
            accumulate(jnp.where(valid, p, 0.0), jnp.where(valid, t, 0.0))

    @pl.when(j == pl.num_programs(1) - 1)
    def _finalize():
        inter = jnp.sum(acc_pt[...])
        sum_p = jnp.sum(acc_p[...])
        sum_t = jnp.sum(acc_t[...])
        sel = jax.lax.broadcasted_iota(jnp.int32, (1, OUT_ROWS, LANE), 1)
        o_ref[...] = jnp.where(
            sel == 0, inter,
            jnp.where(sel == 1, sum_p,
                      jnp.where(sel == 2, sum_t, 0.0)))


def iou_loss(predicted: jax.Array, target: jax.Array,
             smooth: float = 1e-6) -> jax.Array:
    """Pallas equivalent of IoULoss.forward (returns a scalar f32)."""
    p = predicted.reshape(-1)
    t = target.reshape(-1)
    # Non-float inputs (bool / int masks) are promoted on the host; float
    # inputs (f32 / bf16) stream to the kernel in their native dtype.
    if not jnp.issubdtype(p.dtype, jnp.floating):
        p = p.astype(jnp.float32)
    if not jnp.issubdtype(t.dtype, jnp.floating):
        t = t.astype(jnp.float32)

    n = p.shape[0]
    if n == 0:
        return jnp.float32(1.0)

    # Pad only when n is not a lane multiple (zero padding leaves all three
    # sums unchanged). Typical NCHW segmentation tensors skip this copy.
    n_lanes = _round_up(n, LANE)
    if n_lanes != n:
        p = jnp.pad(p, (0, n_lanes - n))
        t = jnp.pad(t, (0, n_lanes - n))
    rows = n_lanes // LANE
    p2 = p.reshape(rows, LANE)
    t2 = t.reshape(rows, LANE)

    block_rows = min(MAX_BLOCK_ROWS, _round_up(rows, 8))
    row_blocks = pl.cdiv(rows, block_rows)
    steps = pl.cdiv(row_blocks, NUM_CORE_SPLITS)

    ragged = (rows % block_rows) != 0
    has_duplicates = NUM_CORE_SPLITS * steps > row_blocks
    if ragged:
        mask_from_block = row_blocks - 1
    elif has_duplicates:
        mask_from_block = row_blocks
    else:
        mask_from_block = None

    def in_map(c, j):
        # Clamp so the DMA never targets a block fully past the array; masked
        # (nominal-index based) accumulation zeroes any duplicated block.
        return (jnp.minimum(c * steps + j, row_blocks - 1), 0)

    kernel = functools.partial(
        _iou_partial_kernel,
        total_rows=rows,
        block_rows=block_rows,
        mask_from_block=mask_from_block,
    )

    parts = pl.pallas_call(
        kernel,
        out_shape=jax.ShapeDtypeStruct(
            (NUM_CORE_SPLITS, OUT_ROWS, LANE), jnp.float32),
        grid_spec=pltpu.PrefetchScalarGridSpec(
            num_scalar_prefetch=0,
            grid=(NUM_CORE_SPLITS, steps),
            in_specs=[
                pl.BlockSpec((block_rows, LANE), in_map),
                pl.BlockSpec((block_rows, LANE), in_map),
            ],
            out_specs=pl.BlockSpec((1, OUT_ROWS, LANE),
                                   lambda c, j: (c, 0, 0)),
            scratch_shapes=[
                pltpu.VMEM((block_rows, LANE), jnp.float32),  # sum(p*t) slab
                pltpu.VMEM((block_rows, LANE), jnp.float32),  # sum(p)   slab
                pltpu.VMEM((block_rows, LANE), jnp.float32),  # sum(t)   slab
            ],
        ),
        compiler_params=pltpu.CompilerParams(
            dimension_semantics=("parallel", "arbitrary"),
        ),
    )(p2, t2)

    # Combine the per-core partials and apply the (exact) module formula:
    #   1 - (p*t).sum() / (p.sum() + t.sum() - (p*t).sum() + smooth)
    totals = jnp.sum(parts[:, :3, 0], axis=0)
    inter, sum_p, sum_t = totals[0], totals[1], totals[2]
    return 1.0 - inter / (sum_p + sum_t - inter + smooth)


def _iou_loss_ref(predicted, target, smooth=1e-6):
    p = predicted.reshape(-1).astype(jnp.float32)
    t = target.reshape(-1).astype(jnp.float32)
    inter = jnp.sum(p * t)
    return 1.0 - inter / (jnp.sum(p) + jnp.sum(t) - inter + smooth)


if __name__ == "__main__":
    key = jax.random.PRNGKey(0)
    k1, k2 = jax.random.split(key)
    # NCHW-style segmentation tensors (sigmoid probabilities & binary mask).
    pred = jax.nn.sigmoid(jax.random.normal(k1, (2, 4, 16, 16), dtype=jnp.float32))
    targ = (jax.random.uniform(k2, (2, 4, 16, 16)) > 0.5).astype(jnp.float32)

    loss = jax.block_until_ready(iou_loss(pred, targ))
    ref = jax.block_until_ready(_iou_loss_ref(pred, targ))

    assert jnp.allclose(loss, ref, atol=1e-5, rtol=1e-5), (loss, ref)
    print("KERNEL_OK")
</pallas_src>

<mosaic_0001>
module attributes {stable_mosaic.version = 11 : i64} {
  func.func @_iou_partial_kernel(%arg0: i32, %arg1: i32, %arg2: memref<16x128xf32, #tpu.memory_space<vmem>>, %arg3: memref<16x128xf32, #tpu.memory_space<vmem>>, %arg4: memref<1x8x128xf32, #tpu.memory_space<vmem>>, %arg5: memref<16x128xf32, #tpu.memory_space<vmem>>, %arg6: memref<16x128xf32, #tpu.memory_space<vmem>>, %arg7: memref<16x128xf32, #tpu.memory_space<vmem>>) attributes {dimension_semantics = [#tpu.dimension_semantics<parallel>, #tpu.dimension_semantics<arbitrary>], iteration_bounds = array<i64: 2, 1>, scalar_prefetch = 0 : i64, scratch_operands = 3 : i64, tpu.core_type = #tpu.core_type<tc>, window_params = [{transform_indices = @transform_0, window_bounds = array<i64: 16, 128>}, {transform_indices = @transform_1, window_bounds = array<i64: 16, 128>}, {transform_indices = @transform_2, window_bounds = array<i64: 1, 8, 128>}]} {
    %c0_i32 = arith.constant 0 : i32
    %0 = arith.cmpi eq, %arg1, %c0_i32 : i32
    %1 = arith.extui %0 : i1 to i32
    %c0_i32_0 = arith.constant 0 : i32
    %2 = arith.cmpi ne, %1, %c0_i32_0 : i32
    scf.if %2 {
      %cst = arith.constant 0.000000e+00 : f32
      %16 = vector.broadcast %cst : f32 to vector<16x128xf32>
      %c0_10 = arith.constant 0 : index
      %c0_11 = arith.constant 0 : index
      %17 = vector.load %arg5[%c0_10, %c0_11] : memref<16x128xf32, #tpu.memory_space<vmem>>, vector<16x128xf32>
      tpu.vector_store %arg5[%c0_10, %c0_11], %16 {strides = array<i32>} : memref<16x128xf32, #tpu.memory_space<vmem>>, vector<16x128xf32>,
      %cst_12 = arith.constant 0.000000e+00 : f32
      %18 = vector.broadcast %cst_12 : f32 to vector<16x128xf32>
      %c0_13 = arith.constant 0 : index
      %c0_14 = arith.constant 0 : index
      %19 = vector.load %arg6[%c0_13, %c0_14] : memref<16x128xf32, #tpu.memory_space<vmem>>, vector<16x128xf32>
      tpu.vector_store %arg6[%c0_13, %c0_14], %18 {strides = array<i32>} : memref<16x128xf32, #tpu.memory_space<vmem>>, vector<16x128xf32>,
      %cst_15 = arith.constant 0.000000e+00 : f32
      %20 = vector.broadcast %cst_15 : f32 to vector<16x128xf32>
      %c0_16 = arith.constant 0 : index
      %c0_17 = arith.constant 0 : index
      %21 = vector.load %arg7[%c0_16, %c0_17] : memref<16x128xf32, #tpu.memory_space<vmem>>, vector<16x128xf32>
      tpu.vector_store %arg7[%c0_16, %c0_17], %20 {strides = array<i32>} : memref<16x128xf32, #tpu.memory_space<vmem>>, vector<16x128xf32>,
    } else {
    }
    %c0 = arith.constant 0 : index
    %c0_1 = arith.constant 0 : index
    %3 = vector.load %arg2[%c0, %c0_1] : memref<16x128xf32, #tpu.memory_space<vmem>>, vector<16x128xf32>
    %c0_2 = arith.constant 0 : index
    %c0_3 = arith.constant 0 : index
    %4 = vector.load %arg3[%c0_2, %c0_3] : memref<16x128xf32, #tpu.memory_space<vmem>>, vector<16x128xf32>
    %c1_i32 = arith.constant 1 : i32
    %5 = arith.muli %arg0, %c1_i32 : i32
    %6 = arith.addi %5, %arg1 : i32
    %c1_i32_4 = arith.constant 1 : i32
    %7 = arith.cmpi slt, %6, %c1_i32_4 : i32
    %8 = arith.extui %7 : i1 to i32
    %c0_i32_5 = arith.constant 0 : i32
    %9 = arith.cmpi ne, %8, %c0_i32_5 : i32
    scf.if %9 {
      %c0_10 = arith.constant 0 : index
      %c0_11 = arith.constant 0 : index
      %16 = vector.load %arg5[%c0_10, %c0_11] : memref<16x128xf32, #tpu.memory_space<vmem>>, vector<16x128xf32>
      %17 = arith.mulf %3, %4 : vector<16x128xf32>
      %18 = arith.addf %16, %17 : vector<16x128xf32>
      %c0_12 = arith.constant 0 : index
      %c0_13 = arith.constant 0 : index
      %19 = vector.load %arg5[%c0_12, %c0_13] : memref<16x128xf32, #tpu.memory_space<vmem>>, vector<16x128xf32>
      tpu.vector_store %arg5[%c0_12, %c0_13], %18 {strides = array<i32>} : memref<16x128xf32, #tpu.memory_space<vmem>>, vector<16x128xf32>,
      %c0_14 = arith.constant 0 : index
      %c0_15 = arith.constant 0 : index
      %20 = vector.load %arg6[%c0_14, %c0_15] : memref<16x128xf32, #tpu.memory_space<vmem>>, vector<16x128xf32>
      %21 = arith.addf %20, %3 : vector<16x128xf32>
      %c0_16 = arith.constant 0 : index
      %c0_17 = arith.constant 0 : index
      %22 = vector.load %arg6[%c0_16, %c0_17] : memref<16x128xf32, #tpu.memory_space<vmem>>, vector<16x128xf32>
      tpu.vector_store %arg6[%c0_16, %c0_17], %21 {strides = array<i32>} : memref<16x128xf32, #tpu.memory_space<vmem>>, vector<16x128xf32>,
      %c0_18 = arith.constant 0 : index
      %c0_19 = arith.constant 0 : index
      %23 = vector.load %arg7[%c0_18, %c0_19] : memref<16x128xf32, #tpu.memory_space<vmem>>, vector<16x128xf32>
      %24 = arith.addf %23, %4 : vector<16x128xf32>
      %c0_20 = arith.constant 0 : index
      %c0_21 = arith.constant 0 : index
      %25 = vector.load %arg7[%c0_20, %c0_21] : memref<16x128xf32, #tpu.memory_space<vmem>>, vector<16x128xf32>
      tpu.vector_store %arg7[%c0_20, %c0_21], %24 {strides = array<i32>} : memref<16x128xf32, #tpu.memory_space<vmem>>, vector<16x128xf32>,
    } else {
    }
    %c1_i32_6 = arith.constant 1 : i32
    %10 = arith.cmpi sge, %6, %c1_i32_6 : i32
    %11 = arith.extui %10 : i1 to i32
    %c0_i32_7 = arith.constant 0 : i32
    %12 = arith.cmpi ne, %11, %c0_i32_7 : i32
    scf.if %12 {
      %16 = tpu.iota {dimensions = array<i32: 0>} : vector<16x128xi32>
      %c16_i32 = arith.constant 16 : i32
      %17 = arith.muli %6, %c16_i32 : i32
      %18 = vector.broadcast %17 : i32 to vector<16x128xi32>
      %19 = arith.addi %18, %16 : vector<16x128xi32>
      %c16_i32_10 = arith.constant 16 : i32
      %20 = vector.broadcast %c16_i32_10 : i32 to vector<16x128xi32>
      %21 = arith.cmpi slt, %19, %20 : vector<16x128xi32>
      %cst = arith.constant 0.000000e+00 : f32
      %22 = vector.broadcast %cst : f32 to vector<16x128xf32>
      %23 = arith.select %21, %3, %22 : vector<16x128xi1>, vector<16x128xf32>
      %cst_11 = arith.constant 0.000000e+00 : f32
      %24 = vector.broadcast %cst_11 : f32 to vector<16x128xf32>
      %25 = arith.select %21, %4, %24 : vector<16x128xi1>, vector<16x128xf32>
      %c0_12 = arith.constant 0 : index
      %c0_13 = arith.constant 0 : index
      %26 = vector.load %arg5[%c0_12, %c0_13] : memref<16x128xf32, #tpu.memory_space<vmem>>, vector<16x128xf32>
      %27 = arith.mulf %23, %25 : vector<16x128xf32>
      %28 = arith.addf %26, %27 : vector<16x128xf32>
      %c0_14 = arith.constant 0 : index
      %c0_15 = arith.constant 0 : index
      %29 = vector.load %arg5[%c0_14, %c0_15] : memref<16x128xf32, #tpu.memory_space<vmem>>, vector<16x128xf32>
      tpu.vector_store %arg5[%c0_14, %c0_15], %28 {strides = array<i32>} : memref<16x128xf32, #tpu.memory_space<vmem>>, vector<16x128xf32>,
      %c0_16 = arith.constant 0 : index
      %c0_17 = arith.constant 0 : index
      %30 = vector.load %arg6[%c0_16, %c0_17] : memref<16x128xf32, #tpu.memory_space<vmem>>, vector<16x128xf32>
      %31 = arith.addf %30, %23 : vector<16x128xf32>
      %c0_18 = arith.constant 0 : index
      %c0_19 = arith.constant 0 : index
      %32 = vector.load %arg6[%c0_18, %c0_19] : memref<16x128xf32, #tpu.memory_space<vmem>>, vector<16x128xf32>
      tpu.vector_store %arg6[%c0_18, %c0_19], %31 {strides = array<i32>} : memref<16x128xf32, #tpu.memory_space<vmem>>, vector<16x128xf32>,
      %c0_20 = arith.constant 0 : index
      %c0_21 = arith.constant 0 : index
      %33 = vector.load %arg7[%c0_20, %c0_21] : memref<16x128xf32, #tpu.memory_space<vmem>>, vector<16x128xf32>
      %34 = arith.addf %33, %25 : vector<16x128xf32>
      %c0_22 = arith.constant 0 : index
      %c0_23 = arith.constant 0 : index
      %35 = vector.load %arg7[%c0_22, %c0_23] : memref<16x128xf32, #tpu.memory_space<vmem>>, vector<16x128xf32>
      tpu.vector_store %arg7[%c0_22, %c0_23], %34 {strides = array<i32>} : memref<16x128xf32, #tpu.memory_space<vmem>>, vector<16x128xf32>,
    } else {
    }
    %c0_i32_8 = arith.constant 0 : i32
    %13 = arith.cmpi eq, %arg1, %c0_i32_8 : i32
    %14 = arith.extui %13 : i1 to i32
    %c0_i32_9 = arith.constant 0 : i32
    %15 = arith.cmpi ne, %14, %c0_i32_9 : i32
    scf.if %15 {
      %c0_10 = arith.constant 0 : index
      %c0_11 = arith.constant 0 : index
      %16 = vector.load %arg5[%c0_10, %c0_11] : memref<16x128xf32, #tpu.memory_space<vmem>>, vector<16x128xf32>
      %17 = vector.shape_cast %16 : vector<16x128xf32> to vector<1x16x128xf32>
      %cst = arith.constant dense<0.000000e+00> : vector<1xf32>
      %18 = vector.multi_reduction <add>, %17, %cst [1, 2] : vector<1x16x128xf32> to vector<1xf32>
      %19 = vector.shape_cast %18 : vector<1xf32> to vector<1x1x1xf32>
      %20 = vector.extract %19[0, 0, 0] : f32 from vector<1x1x1xf32>
      %c0_12 = arith.constant 0 : index
      %c0_13 = arith.constant 0 : index
      %21 = vector.load %arg6[%c0_12, %c0_13] : memref<16x128xf32, #tpu.memory_space<vmem>>, vector<16x128xf32>
      %22 = vector.shape_cast %21 : vector<16x128xf32> to vector<1x16x128xf32>
      %cst_14 = arith.constant dense<0.000000e+00> : vector<1xf32>
      %23 = vector.multi_reduction <add>, %22, %cst_14 [1, 2] : vector<1x16x128xf32> to vector<1xf32>
      %24 = vector.shape_cast %23 : vector<1xf32> to vector<1x1x1xf32>
      %25 = vector.extract %24[0, 0, 0] : f32 from vector<1x1x1xf32>
      %c0_15 = arith.constant 0 : index
      %c0_16 = arith.constant 0 : index
      %26 = vector.load %arg7[%c0_15, %c0_16] : memref<16x128xf32, #tpu.memory_space<vmem>>, vector<16x128xf32>
      %27 = vector.shape_cast %26 : vector<16x128xf32> to vector<1x16x128xf32>
      %cst_17 = arith.constant dense<0.000000e+00> : vector<1xf32>
      %28 = vector.multi_reduction <add>, %27, %cst_17 [1, 2] : vector<1x16x128xf32> to vector<1xf32>
      %29 = vector.shape_cast %28 : vector<1xf32> to vector<1x1x1xf32>
      %30 = vector.extract %29[0, 0, 0] : f32 from vector<1x1x1xf32>
      %31 = tpu.iota {dimensions = array<i32: 1>} : vector<1x8x128xi32>
      %c0_i32_18 = arith.constant 0 : i32
      %32 = vector.broadcast %c0_i32_18 : i32 to vector<1x8x128xi32>
      %33 = arith.cmpi eq, %31, %32 : vector<1x8x128xi32>
      %c1_i32_19 = arith.constant 1 : i32
      %34 = vector.broadcast %c1_i32_19 : i32 to vector<1x8x128xi32>
      %35 = arith.cmpi eq, %31, %34 : vector<1x8x128xi32>
      %c2_i32 = arith.constant 2 : i32
      %36 = vector.broadcast %c2_i32 : i32 to vector<1x8x128xi32>
      %37 = arith.cmpi eq, %31, %36 : vector<1x8x128xi32>
      %cst_20 = arith.constant 0.000000e+00 : f32
      %38 = vector.broadcast %30 : f32 to vector<1x8x128xf32>
      %39 = vector.broadcast %cst_20 : f32 to vector<1x8x128xf32>
      %40 = arith.select %37, %38, %39 : vector<1x8x128xi1>, vector<1x8x128xf32>
      %41 = vector.broadcast %25 : f32 to vector<1x8x128xf32>
      %42 = arith.select %35, %41, %40 : vector<1x8x128xi1>, vector<1x8x128xf32>
      %43 = vector.broadcast %20 : f32 to vector<1x8x128xf32>
      %44 = arith.select %33, %43, %42 : vector<1x8x128xi1>, vector<1x8x128xf32>
      %c0_21 = arith.constant 0 : index
      %c0_22 = arith.constant 0 : index
      %c0_23 = arith.constant 0 : index
      %45 = vector.load %arg4[%c0_21, %c0_22, %c0_23] : memref<1x8x128xf32, #tpu.memory_space<vmem>>, vector<1x8x128xf32>
      tpu.vector_store %arg4[%c0_21, %c0_22, %c0_23], %44 {strides = array<i32>} : memref<1x8x128xf32, #tpu.memory_space<vmem>>, vector<1x8x128xf32>,
    } else {
    }
    return
  }
  func.func @transform_0(%arg0: i32, %arg1: i32) -> (i32, i32) {
    %c1_i32 = arith.constant 1 : i32
    %0 = arith.muli %arg0, %c1_i32 : i32
    %1 = arith.addi %0, %arg1 : i32
    %c0_i32 = arith.constant 0 : i32
    %2 = arith.minsi %1, %c0_i32 : i32
    %c0_i32_0 = arith.constant 0 : i32
    %c0_i32_1 = arith.constant 0 : i32
    return %2, %c0_i32_0 : i32, i32
  }
  func.func @transform_1(%arg0: i32, %arg1: i32) -> (i32, i32) {
    %c1_i32 = arith.constant 1 : i32
    %0 = arith.muli %arg0, %c1_i32 : i32
    %1 = arith.addi %0, %arg1 : i32
    %c0_i32 = arith.constant 0 : i32
    %2 = arith.minsi %1, %c0_i32 : i32
    %c0_i32_0 = arith.constant 0 : i32
    %c0_i32_1 = arith.constant 0 : i32
    return %2, %c0_i32_0 : i32, i32
  }
  func.func @transform_2(%arg0: i32, %arg1: i32) -> (i32, i32, i32) {
    %c0_i32 = arith.constant 0 : i32
    %c0_i32_0 = arith.constant 0 : i32
    %c0_i32_1 = arith.constant 0 : i32
    return %arg0, %c0_i32, %c0_i32_0 : i32, i32, i32
  }
}

</mosaic_0001>

<bundles_post_ra>
// kernel: tpu_custom_call.1
= control target key start
LH: loop header
LB: loop body
LE: loop exit
PB: predicated region body
PF: predicated region fallthrough
CT: control target
= control target key end

     0   :  { %7 = vsyncpa [#allocation6], 0  ;;  %s987_s0 = inlined_call_operand.hbm [shape: f32[16,128], index: 0, kind: input, shape index: {}]   ;;  %s988_s1 = inlined_call_operand.hbm [shape: f32[16,128], index: 1, kind: input, shape index: {}]   ;;  %s989_s2 = inlined_call_operand.hbm [shape: f32[2,8,128], index: 2, kind: output, shape index: {}]  }
   0x1   :  { %9 = vsyncpa [#allocation6 + $0x1], 0 }
   0x2   :  { %10 = vsyncpa [#allocation9], 0 }
   0x3   :  { %12 = vsyncpa [#allocation9 + $0x1], 0 }
   0x4   :  { %13 = vsyncpa [#allocation7], 0 }
   0x5   :  { %15 = vsyncpa [#allocation7 + $0x1], 0  ;;  %s789_s9 = smov 0   ;;  %s791_s10 = smov 0  }
   0x6   :  { %s793_s11 = smov 0   ;;  %s795_s12 = smov 0  }
   0x7   :  { %s797_s13 = smov 0   ;;  %s799_s14 = smov 0  }
   0x8   :  { %s801_s15 = smov 0   ;;  %s803_s16 = smov 0  }
   0x9 LB: > { %s482_s17 = sadd.s32 4294967295, %s766_s16   ;;  %s483_s18 = sadd.s32 4294967294, %s766_s16   ;;  %s766_s16 = sphi %s803_s16, %s21_s16   ;;  %s762_s15 = sphi %s801_s15, %s1008_s15   ;;  %s758_s14 = sphi %s799_s14, %s1007_s14   ;;  %s754_s13 = sphi %s797_s13, %s977_s13   ;;  %s750_s12 = sphi %s795_s12, %s1006_s12   ;;  %s746_s11 = sphi %s793_s11, %s1005_s11   ;;  %s742_s10 = sphi %s791_s10, %s1004_s10   ;;  %s738_s9 = sphi %s789_s9, %s1003_s9  }
   0xa   : > { %s33_s19 = sadd.s32 1, %s762_s15  ;;  %p735_p1 = scmp.ne.s32.totalorder %s754_s13, 0 }
   0xb   : > { %p35_p0 = scmp.ge.s32.totalorder %s33_s19, 2  ;;  %p54_p2 = scmp.eq.s32.totalorder %s766_s16, 0 }
   0xc   : > { %p59_p3 = scmp.ne.s32.totalorder %s754_s13, %s750_s12  ;;  %p60_p5 = scmp.eq.s32.totalorder %s482_s17, 0 }
   0xd   : > { %s1010_s19 = smov (%p35_p0, %s33_s19), 0  ;;  %p835_p4 = por %p735_p1, %p54_p2 }
   0xe   : > { %p839_p6 = por %p60_p5, %p59_p3  ;;  %s101_s22 = ssub.s32 %s762_s15, %s1010_s19 }
   0xf   : > { %p102_p7 = scmp.eq.s32.totalorder %s101_s22, 0  ;;  %s104_s23 = sadd.s32 1, %s746_s11 }
  0x10   : > { %s993_s21 = scalar_select %p839_p6, 1, 0 }
  0x11   : > { %s847_s24 = scalar_select %p102_p7, %s746_s11, %s104_s23  }
  0x12   : > { %p114_p8 = scmp.ne.s32.totalorder %s746_s11, %s742_s10  ;;  %p115_p9 = scmp.eq.s32.totalorder %s482_s17, 1 }
  0x13   : > { %p120_p10 = scmp.ne.s32.totalorder %s742_s10, %s738_s9  ;;  %p121_p11 = scmp.eq.s32.totalorder %s483_s18, 1 }
  0x14   : > { %p853_p12 = por %p115_p9, %p114_p8  ;;  %p528_p1 = scmp.lt.s32.totalorder %s766_s16, 2 }
  0x15   : > { %p858_p0 = por %p121_p11, %p120_p10  ;;  %s768_s27 = smov [#allocation5]  }
  0x16   : > { %s994_s25 = scalar_select %p853_p12, 1, 0 }
  0x17   : > { %s995_s26 = scalar_select %p858_p0, 1, 0 }
  0x18   : > { %s155_s28 = sshll.u32 %s768_s27, 4  ;;  %p865_p2 = pnand %p528_p1, %p835_p4  ;;  %s156_s28 = int_to_ptr.vmem [resolvable:$true] %s155_s28 }
  0x19   : > { %s605_s4 = scalar_lea.hbm %s987_s0, 256 }
  0x1a   : > { %p606_p3 = scmp.ne.s32.totalorder %s987_s0, %s605_s4  ;;  %p607_p5 = pneg %p865_p2 }
  0x1b   : > { %p612_p8 = scmp.lt.s32.totalorder %s605_s4, %s605_s4 }
  0x1c   : > { %p608_p7 = pnand %p607_p5, %p606_p3 }
  0x1e   : > { %p609_p4 = pneg %p608_p7 }
  0x20   : > { %p614_p9 = pnand %p612_p8, %p609_p4 }
  0x22   : > { %617 = shalt.err (!%p614_p9)
}
  0x23   : > { %s618_s7 = scalar_lea.vmem %s156_s28, 256  ;;  %s625_s8 = scalar_lea.vmem %s156_s28, 512 }
  0x24   : > { %p619_p10 = scmp.ne.s32.totalorder %s156_s28, %s618_s7  ;;  %p626_p13 = scmp.lt.s32.totalorder %s156_s28, %s156_s28 }
  0x25   : > { %p627_p0 = scmp.lt.s32.totalorder %s625_s8, %s618_s7 }
  0x26   : > { %p621_p11 = pnand %p619_p10, %p607_p5 }
  0x27   : > { %p628_p12 = por %p627_p0, %p626_p13 }
  0x28   : > { %p622_p1 = pneg %p621_p11 }
  0x2a   : > { %p629_p6 = pnand %p628_p12, %p622_p1 }
  0x2c   : > { %632 = shalt.err (!%p629_p6)
}
  0x2d   : > { %s769_s12 = smov 128   ;;  %s770_s17 = smov 8  }
  0x2e   : > { %520 = dma.hbm_to_vmem [thread:$0]  (!%p865_p2), %s987_s0, 256, %s156_s28, [#allocation6], %s769_s12, %s769_s12, %s770_s17  }
  0x2f   : > { %p492_p3 = scmp.ge.s32.totalorder %s766_s16, 1  ;;  %p187_p7 = scmp.lt.s32.totalorder %s766_s16, 3 }
  0x30   : > { %s771_s23 = smov [#allocation8]   ;;  %s633_s4 = scalar_lea.hbm %s988_s1, 256 }
  0x31   : > { %p890_p4 = pnand %p492_p3, %p187_p7  ;;  %s179_s27 = sshll.u32 %s771_s23, 4  ;;  %s180_s27 = int_to_ptr.vmem [resolvable:$true] %s179_s27 }
  0x32   : > { %p634_p6 = scmp.ne.s32.totalorder %s988_s1, %s633_s4  ;;  %p640_p0 = scmp.lt.s32.totalorder %s633_s4, %s633_s4 }
  0x33   : > { %s997_s22 = scalar_select %p890_p4, 1, 0 }
  0x34   : > { %p636_p12 = pnand %p634_p6, %p607_p5 }
  0x36   : > { %p637_p13 = pneg %p636_p12 }
  0x38   : > { %p642_p8 = pnand %p640_p0, %p637_p13 }
  0x3a   : > { %645 = shalt.err (!%p642_p8)
}
  0x3b   : > { %s646_s28 = scalar_lea.vmem %s180_s27, 256  ;;  %s653_s7 = scalar_lea.vmem %s180_s27, 512 }
  0x3c   : > { %p647_p9 = scmp.ne.s32.totalorder %s180_s27, %s646_s28  ;;  %p654_p1 = scmp.lt.s32.totalorder %s180_s27, %s180_s27 }
  0x3d   : > { %p655_p3 = scmp.lt.s32.totalorder %s653_s7, %s646_s28 }
  0x3e   : > { %p649_p10 = pnand %p647_p9, %p607_p5 }
  0x3f   : > { %p656_p7 = por %p655_p3, %p654_p1 }
  0x40   : > { %p650_p11 = pneg %p649_p10 }
  0x42   : > { %p657_p4 = pnand %p656_p7, %p650_p11 }
  0x44   : > { %660 = shalt.err (!%p657_p4)
}
  0x45   : > { %523 = dma.hbm_to_vmem [thread:$0]  (!%p865_p2), %s988_s1, 256, %s180_s27, [#allocation9], %s769_s12, %s769_s12, %s770_s17  }
  0x46   : > { %p998_p6 = scmp.ne.s32.totalorder %s997_s22, 0 }
  0x47   : > { %s193_s20 = sand.u32 (!%p998_p6), 1, %s754_s13   ;;  %p999_p5 = scmp.ne.s32.totalorder (!%p998_p6), %s993_s21, 0 }
  0x48   : > { %191 = sbr.rel (%p998_p6) target bundleno = 347 (0x15b), region = 28  ;;  %s493_s23 = sshll.u32 (!%p998_p6), %s193_s20, 4 }
  0x49   : > { %s194_s30 = scalar_lea.sflag (!%p998_p6), [#allocation6], %s193_s20  ;;  %s197_s3 = scalar_lea.vmem (!%p998_p6), [#allocation5], %s493_s23 }
  0x4d   : > { %724 = dma.done.wait (%p999_p5), %s194_s30, 256  }
  0x4e   : > { %726 = vsyncadd (%p999_p5), %s194_s30, 4294967040  ;;  %s203_s29 = scalar_lea.sflag [#allocation9], %s193_s20  ;;  %s206_s4 = scalar_lea.vmem [#allocation8], %s493_s23 }
  0x4f   : > { %728 = dma.done.wait (%p999_p5), %s203_s29, 256  }
  0x50   : > { %730 = vsyncadd (%p999_p5), %s203_s29, 4294967040  ;;  %s229_s12 = sand.u32 1, %s742_s10   ;;  %v772_v0 = vmov 0.0   ;;  %v250_v1 = vld [vmem:[%s197_s3] sm:$0xff]  ;;  %v251_v2 = vld [vmem:[%s197_s3 + $0x8] sm:$0xff]  ;;  %p496_p2 = scmp.ge.s32.totalorder %s758_s14, 1 }
  0x51   : > { %s925_s17 = sshll.u32 %s229_s12, 3  ;;  %244 = vst [vmem:[#allocation2] sm:$0xff] %v772_v0  ;;  %245 = vst [vmem:[#allocation2 + $0x8] sm:$0xff] %v772_v0  ;;  %v252_v3 = vld [vmem:[%s206_s4] sm:$0xff]  ;;  %v253_v4 = vld [vmem:[%s206_s4 + $0x8] sm:$0xff] }
  0x52   : > { %246 = vst [vmem:[#allocation3 + $0x8] sm:$0xff] %v772_v0  ;;  %247 = vst [vmem:[#allocation3] sm:$0xff] %v772_v0  ;;  %s231_s21 = scalar_lea.vmem [#allocation10], %s925_s17  ;;  %258 = sbr.rel (%p496_p2) target bundleno = 94 (0x5e), region = 44 }
  0x53   : > { %248 = vst [vmem:[#allocation4 + $0x8] sm:$0xff] %v772_v0  ;;  %249 = vst [vmem:[#allocation4] sm:$0xff] %v772_v0 }
  0x57   : > { %v261_v6 = vmul.f32 %v252_v3, %v250_v1  ;;  %v262_v8 = vmul.f32 %v253_v4, %v251_v2 }
  0x58   : > { %v259_v5 = vld [vmem:[#allocation2] sm:$0xff]  ;;  %v260_v7 = vld [vmem:[#allocation2 + $0x8] sm:$0xff] }
  0x59   : > { %v267_v9 = vld [vmem:[#allocation3 + $0x8] sm:$0xff]  ;;  %v268_v11 = vld [vmem:[#allocation3] sm:$0xff]  ;;  %v263_v14 = vadd.f32 %v261_v6, %v259_v5  ;;  %v264_v15 = vadd.f32 %v262_v8, %v260_v7 }
  0x5a   : > { %v269_v10 = vadd.f32 %v267_v9, %v250_v1  ;;  %v273_v12 = vld [vmem:[#allocation4 + $0x8] sm:$0xff]  ;;  %v274_v13 = vld [vmem:[#allocation4] sm:$0xff]  ;;  %v270_v16 = vadd.f32 %v268_v11, %v251_v2 }
  0x5b   : > { %v275_v17 = vadd.f32 %v273_v12, %v252_v3  ;;  %v276_v18 = vadd.f32 %v274_v13, %v253_v4  ;;  %265 = vst [vmem:[#allocation2] sm:$0xff] %v263_v14  ;;  %266 = vst [vmem:[#allocation2 + $0x8] sm:$0xff] %v264_v15 }
  0x5c   : > { %271 = vst [vmem:[#allocation3 + $0x8] sm:$0xff] %v269_v10  ;;  %272 = vst [vmem:[#allocation3] sm:$0xff] %v270_v16 }
  0x5d   : > { %277 = vst [vmem:[#allocation4 + $0x8] sm:$0xff] %v275_v17  ;;  %278 = vst [vmem:[#allocation4] sm:$0xff] %v276_v18 }
  0x5e PF: > { %p497_p4 = scmp.lt.s32.totalorder %s758_s14, 1 }
  0x5f   : > { %s498_s22 = sshll.u32 (!%p497_p4), %s758_s14, 4 }
  0x60   : > { %282 = sbr.rel (%p497_p4) target bundleno = 116 (0x74), region = 48 }
  0x65   : > { %v283_v19 = vlaneseq  ;;  %v287_v20 = vstv %s498_s22  ;;  %v304_v24 = vld [vmem:[#allocation3 + $0x8] sm:$0xff]  ;;  %v310_v25 = vld [vmem:[#allocation4 + $0x8] sm:$0xff]  ;;  %v296_v29 = vld [vmem:[#allocation2] sm:$0xff] }
  0x66   : > { %v305_v30 = vld [vmem:[#allocation3] sm:$0xff]  ;;  %v311_v31 = vld [vmem:[#allocation4] sm:$0xff]  ;;  %v297_v37 = vld [vmem:[#allocation2 + $0x8] sm:$0xff] }
  0x67   : > { %v284_v21 = vshrl.u32 %v283_v19, 7 }
  0x69   : > { %v288_v22 = vadd.s32 %v287_v20, %v284_v21  ;;  %v285_v23 = vadd.s32 8, %v284_v21 }
  0x6b   : > { %vm290_vm0 = vcmp.lt.s32.totalorder %v288_v22, 16  ;;  %v289_v26 = vadd.s32 %v287_v20, %v285_v23 }
  0x6c   : > { %v292_v27 = vsel %vm290_vm0, %v250_v1, 0.0  ;;  %v294_v28 = vsel %vm290_vm0, %v252_v3, 0.0 }
  0x6d   : > { %v298_v32 = vmul.f32 %v294_v28, %v292_v27  ;;  %vm291_vm1 = vcmp.lt.s32.totalorder %v289_v26, 16  ;;  %v306_v33 = vadd.f32 %v304_v24, %v292_v27  ;;  %v312_v34 = vadd.f32 %v310_v25, %v294_v28 }
  0x6e   : > { %v293_v35 = vsel %vm291_vm1, %v251_v2, 0.0  ;;  %v295_v36 = vsel %vm291_vm1, %v253_v4, 0.0 }
  0x6f   : > { %v300_v38 = vadd.f32 %v298_v32, %v296_v29  ;;  %v299_v39 = vmul.f32 %v295_v36, %v293_v35  ;;  %308 = vst [vmem:[#allocation3 + $0x8] sm:$0xff] %v306_v33  ;;  %v307_v40 = vadd.f32 %v305_v30, %v293_v35  ;;  %314 = vst [vmem:[#allocation4 + $0x8] sm:$0xff] %v312_v34 }
  0x70   : > { %v313_v41 = vadd.f32 %v311_v31, %v295_v36 }
  0x71   : > { %302 = vst [vmem:[#allocation2] sm:$0xff] %v300_v38  ;;  %v301_v42 = vadd.f32 %v299_v39, %v297_v37  ;;  %309 = vst [vmem:[#allocation3] sm:$0xff] %v307_v40 }
  0x72   : > { %315 = vst [vmem:[#allocation4] sm:$0xff] %v313_v41 }
  0x73   : > { %303 = vst [vmem:[#allocation2 + $0x8] sm:$0xff] %v301_v42 }
  0x74 PF: > { %v355_v9 = vlaneseq  ;;  %s500_s6 = sshll.u32 %s758_s14, 7  ;;  %s381_s7 = sshll.u32 %s231_s21, 4  ;;  %s382_s7 = int_to_ptr.vmem [resolvable:$true] %s381_s7 }
  0x75   : > { %s937_s20 = scalar_lea.hbm %s989_s2, %s500_s6  ;;  %s368_s14 = scalar_lea.sflag [#allocation7], %s229_s12 }
  0x76   : > { %v343_v43 = vld [vmem:[#allocation4 + $0x8] sm:$0xff]  ;;  %v331_v48 = vld [vmem:[#allocation3 + $0x8] sm:$0xff]  ;;  %v356_v10 = vshrl.u32 %v355_v9, 7  ;;  %s661_s23 = scalar_lea.vmem %s382_s7, 128  ;;  %p1000_p13 = scmp.ne.s32.totalorder %s994_s25, 0 }
  0x77   : > { %p662_p12 = scmp.ne.s32.totalorder %s382_s7, %s661_s23  ;;  %s773_s30 = smov [#allocation10]  }
  0x78   : > { %v319_v45 = vld [vmem:[#allocation2] sm:$0xff]  ;;  %v332_v49 = vld [vmem:[#allocation3] sm:$0xff]  ;;  %vm359_vm2 = vcmp.eq.s32.totalorder %v356_v10, 2  ;;  %vm358_vm3 = vcmp.eq.s32.totalorder %v356_v10, 1  ;;  %vm357_vm4 = vcmp.eq.s32.totalorder %v356_v10, 0  ;;  %s665_s3 = sshll.u32 %s773_s30, 4  ;;  %s666_s3 = int_to_ptr.vmem [resolvable:$false] %s665_s3 }
  0x79   : > { %v344_v44 = vld [vmem:[#allocation4] sm:$0xff]  ;;  %v333_v51 = vadd.f32 %v332_v49, %v331_v48  ;;  %p663_p0 = pnand %p662_p12, %p1000_p13  ;;  %s667_s29 = scalar_lea.vmem %s666_s3, 256 }
  0x7a   : > { %v345_v46 = vadd.f32 %v344_v44, %v343_v43  ;;  %v320_v47 = vld [vmem:[#allocation2 + $0x8] sm:$0xff]  ;;  %p668_p9 = scmp.lt.s32.totalorder %s382_s7, %s666_s3  ;;  %p669_p10 = scmp.lt.s32.totalorder %s667_s29, %s661_s23 }
  0x7b   : > { %v321_v50 = vadd.f32 %v320_v47, %v319_v45  ;;  %p664_p8 = pneg %p663_p0 }
  0x7c   : > { %346 = vadd.xlane.f32.xlu1 %v345_v46  ;;  %p670_p11 = por %p669_p10, %p668_p9 }
  0x7d   : > { %322 = vadd.xlane.f32.xlu0 %v321_v50 }
  0x7e   : > { %p671_p1 = pnand %p670_p11, %p664_p8 }
  0x81   : > { %334 = vadd.xlane.f32.xlu0 %v333_v51 }
 0x105   : > { %v347_v52 = vpop.xlane.xlu1 %346 }
 0x106   : > { %v348_v53 = vrot.slane %v347_v52, 4  ;;  %v323_v54 = vpop.xlane.xlu0 %322 }
 0x107   : > { %v324_v55 = vrot.slane %v323_v54, 4 }
 0x108   : > { %v349_v56 = vadd.f32 %v348_v53, %v347_v52 }
 0x109   : > { %v325_v57 = vadd.f32 %v324_v55, %v323_v54 }
 0x10a   : > { %v350_v58 = vrot.slane %v349_v56, 2  ;;  %v335_v59 = vpop.xlane.xlu0 %334 }
 0x10b   : > { %v326_v60 = vrot.slane %v325_v57, 2  ;;  %v336_v61 = vrot.slane %v335_v59, 4 }
 0x10c   : > { %v351_v0 = vadd.f32 %v350_v58, %v349_v56 }
 0x10d   : > { %v337_v62 = vadd.f32 %v336_v61, %v335_v59  ;;  %v327_v63 = vadd.f32 %v326_v60, %v325_v57 }
 0x10e   : > { %v352_v5 = vrot.slane %v351_v0, 1 }
 0x10f   : > { %v338_v1 = vrot.slane %v337_v62, 2  ;;  %v328_v2 = vrot.slane %v327_v63, 1 }
 0x110   : > { %v353_v8 = vadd.f32 %v352_v5, %v351_v0 }
 0x111   : > { %v339_v3 = vadd.f32 %v338_v1, %v337_v62  ;;  %v329_v4 = vadd.f32 %v328_v2, %v327_v63 }
 0x113   : > { %505 = vpush %v329_v4  ;;  %v340_v6 = vrot.slane %v339_v3, 1 }
 0x115   : > { %v341_v7 = vadd.f32 %v340_v6, %v339_v3 }
 0x117   : > { %507 = vpush %v341_v7 }
 0x118   : > { %509 = vpush %v353_v8 }
 0x144   : > { %s506_s27 = spop %505 }
 0x145   : > { %v364_v14 = vstv %s506_s27 }
 0x148   : > { %s508_s5 = spop %507 }
 0x149   : > { %v362_v11 = vstv %s508_s5  ;;  %s510_s28 = spop %509 }
 0x14a   : > { %v360_v12 = vstv %s510_s28 }
 0x14b   : > { %v361_v13 = vsel %vm359_vm2, %v360_v12, 0.0 }
 0x14c   : > { %v363_v15 = vsel %vm358_vm3, %v362_v11, %v361_v13 }
 0x14d   : > { %v365_v16 = vsel %vm357_vm4, %v364_v14, %v363_v15 }
 0x14e   : > { %366 = vst [vmem:[%s231_s21] sm:$0xff] %v365_v16 }
 0x14f   : > { %674 = shalt.err (!%p671_p1)
}
 0x150   : > { %s675_s4 = scalar_lea.hbm %s937_s20, 128  ;;  %s679_s21 = scalar_lea.hbm %s989_s2, 256 }
 0x151   : > { %p676_p3 = scmp.ne.s32.totalorder %s937_s20, %s675_s4  ;;  %p680_p5 = scmp.lt.s32.totalorder %s937_s20, %s989_s2 }
 0x152   : > { %p681_p2 = scmp.lt.s32.totalorder %s679_s21, %s675_s4 }
 0x153   : > { %p677_p7 = pnand %p676_p3, %p1000_p13 }
 0x154   : > { %p682_p4 = por %p681_p2, %p680_p5 }
 0x155   : > { %p678_p6 = pneg %p677_p7 }
 0x157   : > { %p683_p12 = pnand %p682_p4, %p678_p6 }
 0x159   : > { %686 = shalt.err (!%p683_p12)
}
 0x15a   : > { %515 = dma.vmem_to_hbm [thread:$0]  (%p1000_p13), %s382_s7, 128, %s937_s20, %s368_s14  }
 0x15b PF: > { %s393_s5 = sand.u32 1, %s738_s9   ;;  %p1001_p0 = scmp.ne.s32.totalorder %s995_s26, 0 }
 0x15c   : > { %p1002_p8 = scmp.ge.s32.totalorder %s766_s16, 2  ;;  %s394_s6 = scalar_lea.sflag [#allocation7], %s393_s5 }
 0x15e   : > { %p525_p9 = pnand %p1002_p8, %p1001_p0 }
 0x160   : > { %p526_p10 = pneg %p525_p9 }
 0x162   : > { %732 = dma.done.wait (%p526_p10), %s394_s6, 128  }
 0x163   : > { %734 = vsyncadd (%p526_p10), %s394_s6, 4294967168  ;;  %s21_s16 = sadd.s32 1, %s766_s16   ;;  %s1003_s9 = smov %s742_s10 }
 0x164   : > { %p18_p11 = scmp.ge.s32.totalorder %s21_s16, 4   ;;  %s1004_s10 = smov %s746_s11 }
 0x165   : > { %s1005_s11 = smov %s847_s24  ;;  %s1006_s12 = smov %s754_s13 }
 0x166   : > { %s977_s13 = smov 0   ;;  %s1007_s14 = smov %s762_s15 }
 0x167   : > { %s1008_s15 = smov %s1010_s19  ;;  %20 = sbr.rel (!%p18_p11) target bundleno = 9 (0x9), region = 102 }
 0x16c   :  { %399 = vsyncpa [#allocation6], 1 }
 0x16d   :  { %401 = vsyncpa [#allocation6 + $0x1], 1 }
 0x16e   :  { %402 = vsyncpa [#allocation9], 1 }
 0x16f   :  { %404 = vsyncpa [#allocation9 + $0x1], 1 }
 0x170   :  { %405 = vsyncpa [#allocation7], 1 }
 0x171   :  { %407 = vsyncpa [#allocation7 + $0x1], 1 }

</bundles_post_ra>
